<compile_context>
chip_gen: v6e
topology: v6e:2x2x1
jax: 0.10.0
libtpu: 0.0.40
codegen_flags: <defaults>
</compile_context>

<pallas_src>
import functools

import numpy as np

import jax
import jax.numpy as jnp
from jax.experimental import pallas as pl
from jax.experimental.pallas import tpu as pltpu


def _round_up(a, m):
    return (a + m - 1) // m * m


def _pick_block_batch(n, per_image_bytes, target_bytes):
    """Largest divisor of n with nb*per_image_bytes <= target, keeping >= 2 grid steps."""
    nb = 1
    for cand in range(1, n + 1):
        if n % cand:
            continue
        if n >= 2 and n // cand < 2:
            continue  # keep the parallel grid axis length >= 2 for v7x's 2 TensorCores
        if cand * per_image_bytes <= target_bytes:
            nb = cand
    return nb


# ----------------------------------------------------------------------------
# Kernel: build the (K, HW_pad) patch operand in VMEM from k*k shifted lane
# slices, one fused GEMM for both convs, masked single-pass instance-norm
# moments over the valid columns, sigmoid gating, bf16 lane-dense output.
# ----------------------------------------------------------------------------
def upconv_kernel(x_ref, w_ref, m_ref, o_ref, p_ref, *,
                  cin, k, stride, wp, lq, crr, inv_n):
    # x_ref: (Nb, Cin, Lpad)  bf16 zero-padded images, spatial flattened (row pitch Wp)
    # w_ref: (2*Crr, K)       f32 fused conv1|conv2 weights, K = (kh*k+kw)*Cin + ci
    # m_ref: (1, lq)          f32 1.0 on valid columns (wo < Wo and q < Ho*Wp)
    # o_ref: (Nb, Crr, lq)    bf16 gated, normalized output (padded-row layout)
    # p_ref: (K, lq)          f32 VMEM patch scratch
    colf = m_ref[...]                           # hoisted: constant across images
    w = w_ref[...]

    nb = x_ref.shape[0]
    for b in range(nb):                         # small static images-per-block loop
        xb = x_ref.at[b]                        # (Cin, Lpad) ref view, no load
        for kh in range(k):
            for kw in range(k):
                off = kh * wp + kw
                # TODO(synk): strided (stride>1) tap loads are implemented but not
                #             exercised by the canonical stride=1 UpConv config.
                sl = pl.ds(off, lq) if stride == 1 else pl.ds(off, lq, stride)
                tap = kh * k + kw
                p_ref[pl.ds(tap * cin, cin), :] = xb[:, sl].astype(jnp.float32)

        # One GEMM for both convs (biases cancel in InstanceNorm, affine=False).
        y = jnp.dot(w, p_ref[...], preferred_element_type=jnp.float32)   # (2Crr, lq)

        # Masked single-pass moments over the valid spatial columns.
        ym = y * colf
        s = jnp.sum(ym, axis=-1, keepdims=True)
        sq = jnp.sum(ym * y, axis=-1, keepdims=True)
        mean = s * inv_n
        var = jnp.maximum(sq * inv_n - mean * mean, 0.0)   # clamp: cancellation guard
        yn = (y - mean) * jax.lax.rsqrt(var + 1e-5)        # InstanceNorm2d(affine=False)

        g = yn[:crr] * jax.nn.sigmoid(yn[crr:])            # gated multiply
        o_ref[b] = g.astype(o_ref.dtype)


# ----------------------------------------------------------------------------
# Wrapper: pad + flatten the input (no im2col), call the kernel, strip the
# padded columns and pixel-shuffle (pure layout glue, fused by XLA).
# ----------------------------------------------------------------------------
def upconv2d_forward(x, w1, b1, w2, b2, *, kernel, stride, padding, r,
                     block_bytes_target=1 << 20):
    # x:  [N, Cin, H, W] (NCHW); w*: [Cout*r*r, Cin, k, k]; b*: [Cout*r*r]
    # Biases are NOT used: InstanceNorm2d(affine=False) cancels per-channel constants.
    del b1, b2
    N, Cin, H, W = x.shape
    Crr = w1.shape[0]
    Cout = Crr // (r * r)
    k = kernel

    Hp, Wp = H + 2 * padding, W + 2 * padding
    Ho = (Hp - k) // stride + 1
    Wo = (Wp - k) // stride + 1
    HWo = Ho * Wo
    lq = _round_up(Ho * Wp, 128)                 # lane-dense padded-row spatial length
    K = k * k * Cin
    off_max = (k - 1) * Wp + (k - 1)
    Lpad = max(off_max + stride * (lq - 1) + 1, Hp * Wp)

    # Zero-pad + flatten spatial; keep the big activation operand in bf16.
    xp = jnp.pad(x, ((0, 0), (0, 0), (padding, padding), (padding, padding)))
    xf = xp.reshape(N, Cin, Hp * Wp)
    if Lpad > Hp * Wp:
        xf = jnp.pad(xf, ((0, 0), (0, 0), (0, Lpad - Hp * Wp)))
    xf = xf.astype(jnp.bfloat16)

    # Fused conv1|conv2 weights, tap-major / channel-minor K ordering (tiny, f32).
    w_cat = jnp.concatenate([w1, w2], axis=0)                       # (2Crr, Cin, k, k)
    w_cat = w_cat.transpose(0, 2, 3, 1).reshape(2 * Crr, K).astype(jnp.float32)

    # Valid-column mask for q = ho*Wp + wo (trace-time constant).
    qidx = np.arange(lq, dtype=np.int64)
    valid = ((qidx % Wp) < Wo) & (qidx < Ho * Wp)
    col_mask = jnp.asarray(valid.astype(np.float32).reshape(1, lq))

    # Images per grid step: ~1 MiB blocks, but keep >= 2 grid steps (v7x dual core).
    per_img = Cin * Lpad * 2 + Crr * lq * 2
    nb = _pick_block_batch(N, per_img, block_bytes_target)
    grid = (N // nb,)

    # VMEM budget from actual (double-buffered) block sizes, with headroom; capped
    # below v7x's 64 MiB physical VMEM.
    bytes_in = nb * Cin * Lpad * 2
    bytes_out = nb * Crr * lq * 2
    bytes_w = 2 * Crr * K * 4
    bytes_m = lq * 4
    bytes_scr = _round_up(K, 8) * lq * 4
    bytes_tmp = 10 * (2 * Crr) * lq * 4
    vmem_est = 2 * (bytes_in + bytes_out + bytes_w + bytes_m) + bytes_scr + bytes_tmp
    vmem_limit = int(min(max(4 * vmem_est, 16 << 20), 40 << 20))

    flops = N * (2 * (2 * Crr) * K * lq + 12 * (2 * Crr) * lq)
    transcendentals = N * Crr * lq
    bytes_accessed = N * Cin * Lpad * 2 + 2 * Crr * K * 4 + lq * 4 + N * Crr * lq * 2

    y = pl.pallas_call(
        functools.partial(upconv_kernel, cin=Cin, k=k, stride=stride, wp=Wp,
                          lq=lq, crr=Crr, inv_n=1.0 / HWo),
        out_shape=jax.ShapeDtypeStruct((N, Crr, lq), jnp.bfloat16),
        grid_spec=pltpu.PrefetchScalarGridSpec(
            num_scalar_prefetch=0,
            grid=grid,
            in_specs=[
                pl.BlockSpec((nb, Cin, Lpad), lambda n: (n, 0, 0)),
                pl.BlockSpec((2 * Crr, K), lambda n: (0, 0)),
                pl.BlockSpec((1, lq), lambda n: (0, 0)),
            ],
            out_specs=pl.BlockSpec((nb, Crr, lq), lambda n: (n, 0, 0)),
            scratch_shapes=[pltpu.VMEM((K, lq), jnp.float32)],
        ),
        compiler_params=pltpu.CompilerParams(
            dimension_semantics=("parallel",),
            vmem_limit_bytes=vmem_limit,
        ),
        cost_estimate=pl.CostEstimate(
            flops=flops,
            transcendentals=transcendentals,
            bytes_accessed=bytes_accessed,
        ),
    )(xf, w_cat, col_mask)

    # Strip the junk columns and pixel-shuffle. Pure layout glue: XLA fuses the strip
    # with the shuffle transpose into one pass over the (bf16) output.
    # TODO(synk): fuse the pixel shuffle into the consumer of this op (or emit the
    #             shuffled layout directly) to drop this last HBM round-trip.
    y = y[:, :, :Ho * Wp].reshape(N, Crr, Ho, Wp)[:, :, :, :Wo]     # (N, Crr, Ho, Wo)
    y = y.reshape(N, Cout, r, r, Ho, Wo).transpose(0, 1, 4, 2, 5, 3)
    # Returned in bf16 (kernel output dtype); consumers wanting f32 can cast.
    return y.reshape(N, Cout, Ho * r, Wo * r)


# ----------------------------------------------------------------------------
# Pure-JAX reference (keeps the biases -- they must cancel in the norm; bf16
# conv operands with f32 accumulation so the comparison with the kernel is tight).
# ----------------------------------------------------------------------------
def reference_forward(x, w1, b1, w2, b2, *, kernel, stride, padding, r):
    dn = jax.lax.conv_dimension_numbers(x.shape, w1.shape, ("NCHW", "OIHW", "NCHW"))
    xb = x.astype(jnp.bfloat16)

    def conv(w, b):
        y = jax.lax.conv_general_dilated(
            xb, w.astype(jnp.bfloat16), window_strides=(stride, stride),
            padding=[(padding, padding), (padding, padding)],
            dimension_numbers=dn, preferred_element_type=jnp.float32)
        return y + b[None, :, None, None]

    def inorm(y):
        m = jnp.mean(y, axis=(2, 3), keepdims=True)
        v = jnp.mean(jnp.square(y - m), axis=(2, 3), keepdims=True)
        return (y - m) / jnp.sqrt(v + 1e-5)

    y1 = inorm(conv(w1, b1))
    y2 = inorm(conv(w2, b2))
    y3 = y1 * jax.nn.sigmoid(y2)
    N, Crr, Ho, Wo = y3.shape
    Cout = Crr // (r * r)
    y3 = y3.reshape(N, Cout, r, r, Ho, Wo).transpose(0, 1, 4, 2, 5, 3)
    return y3.reshape(N, Cout, Ho * r, Wo * r)


if __name__ == "__main__":
    # Small shapes consistent with the module.
    N, Cin, H, W = 2, 4, 16, 16
    Cout, kernel, stride, padding, r = 4, 3, 1, 1, 2
    Crr = Cout * r * r

    key = jax.random.PRNGKey(0)
    kx, kw1, kb1, kw2, kb2 = jax.random.split(key, 5)

    x = jax.random.normal(kx, (N, Cin, H, W), dtype=jnp.float32)
    w1 = jax.random.normal(kw1, (Crr, Cin, kernel, kernel), dtype=jnp.float32) * 0.1
    b1 = jax.random.normal(kb1, (Crr,), dtype=jnp.float32) * 0.1
    w2 = jax.random.normal(kw2, (Crr, Cin, kernel, kernel), dtype=jnp.float32) * 0.1
    b2 = jax.random.normal(kb2, (Crr,), dtype=jnp.float32) * 0.1

    fwd = functools.partial(upconv2d_forward, kernel=kernel, stride=stride,
                            padding=padding, r=r)
    out = jax.block_until_ready(jax.jit(fwd)(x, w1, b1, w2, b2))

    ref = reference_forward(x, w1, b1, w2, b2, kernel=kernel, stride=stride,
                            padding=padding, r=r)
    assert out.shape == (N, Cout, H * r, W * r), out.shape
    err = float(jnp.max(jnp.abs(out.astype(jnp.float32) - ref)))
    assert jnp.allclose(out.astype(jnp.float32), ref, atol=2e-2, rtol=2e-2), err

    print("KERNEL_OK")
</pallas_src>

<mosaic_0001>
module attributes {stable_mosaic.version = 11 : i64} {
  func.func @upconv_kernel(%arg0: i32, %arg1: memref<1x4x422xbf16, #tpu.memory_space<vmem>>, %arg2: memref<32x36xf32, #tpu.memory_space<vmem>>, %arg3: memref<1x384xf32, #tpu.memory_space<vmem>>, %arg4: memref<1x16x384xbf16, #tpu.memory_space<vmem>>, %arg5: memref<36x384xf32, #tpu.memory_space<vmem>>) attributes {dimension_semantics = [#tpu.dimension_semantics<parallel>], iteration_bounds = array<i64: 2>, scalar_prefetch = 0 : i64, scratch_operands = 1 : i64, tpu.core_type = #tpu.core_type<tc>, window_params = [{transform_indices = @transform_0, window_bounds = array<i64: 1, 4, 422>}, {pipeline_mode = #tpu.pipeline_mode<synchronous>, transform_indices = @transform_1, window_bounds = array<i64: 32, 36>}, {pipeline_mode = #tpu.pipeline_mode<synchronous>, transform_indices = @transform_2, window_bounds = array<i64: 1, 384>}, {transform_indices = @transform_3, window_bounds = array<i64: 1, 16, 384>}]} {
    %c0 = arith.constant 0 : index
    %c0_0 = arith.constant 0 : index
    %0 = vector.load %arg3[%c0, %c0_0] : memref<1x384xf32, #tpu.memory_space<vmem>>, vector<1x384xf32>
    %c0_1 = arith.constant 0 : index
    %c0_2 = arith.constant 0 : index
    %1 = vector.load %arg2[%c0_1, %c0_2] : memref<32x36xf32, #tpu.memory_space<vmem>>, vector<32x36xf32>
    %c0_i32 = arith.constant 0 : i32
    %c0_i32_3 = arith.constant 0 : i32
    %c0_i32_4 = arith.constant 0 : i32
    %2 = tpu.memref_slice %arg1[%c0_i32, %c0_i32_3, %c0_i32_4] : memref<1x4x422xbf16, #tpu.memory_space<vmem>> -> memref<1x4x422xbf16, #tpu.memory_space<vmem>>
    %3 = tpu.memref_squeeze %2 : memref<1x4x422xbf16, #tpu.memory_space<vmem>> -> memref<4x422xbf16, #tpu.memory_space<vmem>>
    %c0_5 = arith.constant 0 : index
    %c0_6 = arith.constant 0 : index
    %4 = vector.load %3[%c0_5, %c0_6] : memref<4x422xbf16, #tpu.memory_space<vmem>>, vector<4x384xbf16>
    %5 = arith.extf %4 : vector<4x384xbf16> to vector<4x384xf32>
    %c0_7 = arith.constant 0 : index
    %c0_8 = arith.constant 0 : index
    %6 = vector.load %arg5[%c0_7, %c0_8] : memref<36x384xf32, #tpu.memory_space<vmem>>, vector<4x384xf32>
    tpu.vector_store %arg5[%c0_7, %c0_8], %5 {strides = array<i32>} : memref<36x384xf32, #tpu.memory_space<vmem>>, vector<4x384xf32>,
    %c0_i32_9 = arith.constant 0 : i32
    %c0_i32_10 = arith.constant 0 : i32
    %c0_i32_11 = arith.constant 0 : i32
    %7 = tpu.memref_slice %arg1[%c0_i32_9, %c0_i32_10, %c0_i32_11] : memref<1x4x422xbf16, #tpu.memory_space<vmem>> -> memref<1x4x422xbf16, #tpu.memory_space<vmem>>
    %8 = tpu.memref_squeeze %7 : memref<1x4x422xbf16, #tpu.memory_space<vmem>> -> memref<4x422xbf16, #tpu.memory_space<vmem>>
    %c0_12 = arith.constant 0 : index
    %c1 = arith.constant 1 : index
    %9 = vector.load %8[%c0_12, %c1] : memref<4x422xbf16, #tpu.memory_space<vmem>>, vector<4x384xbf16>
    %10 = arith.extf %9 : vector<4x384xbf16> to vector<4x384xf32>
    %c4 = arith.constant 4 : index
    %c0_13 = arith.constant 0 : index
    %11 = vector.load %arg5[%c4, %c0_13] : memref<36x384xf32, #tpu.memory_space<vmem>>, vector<4x384xf32>
    tpu.vector_store %arg5[%c4, %c0_13], %10 {strides = array<i32>} : memref<36x384xf32, #tpu.memory_space<vmem>>, vector<4x384xf32>,
    %c0_i32_14 = arith.constant 0 : i32
    %c0_i32_15 = arith.constant 0 : i32
    %c0_i32_16 = arith.constant 0 : i32
    %12 = tpu.memref_slice %arg1[%c0_i32_14, %c0_i32_15, %c0_i32_16] : memref<1x4x422xbf16, #tpu.memory_space<vmem>> -> memref<1x4x422xbf16, #tpu.memory_space<vmem>>
    %13 = tpu.memref_squeeze %12 : memref<1x4x422xbf16, #tpu.memory_space<vmem>> -> memref<4x422xbf16, #tpu.memory_space<vmem>>
    %c0_17 = arith.constant 0 : index
    %c2 = arith.constant 2 : index
    %14 = vector.load %13[%c0_17, %c2] : memref<4x422xbf16, #tpu.memory_space<vmem>>, vector<4x384xbf16>
    %15 = arith.extf %14 : vector<4x384xbf16> to vector<4x384xf32>
    %c8 = arith.constant 8 : index
    %c0_18 = arith.constant 0 : index
    %16 = vector.load %arg5[%c8, %c0_18] : memref<36x384xf32, #tpu.memory_space<vmem>>, vector<4x384xf32>
    tpu.vector_store %arg5[%c8, %c0_18], %15 {strides = array<i32>} : memref<36x384xf32, #tpu.memory_space<vmem>>, vector<4x384xf32>,
    %c0_i32_19 = arith.constant 0 : i32
    %c0_i32_20 = arith.constant 0 : i32
    %c0_i32_21 = arith.constant 0 : i32
    %17 = tpu.memref_slice %arg1[%c0_i32_19, %c0_i32_20, %c0_i32_21] : memref<1x4x422xbf16, #tpu.memory_space<vmem>> -> memref<1x4x422xbf16, #tpu.memory_space<vmem>>
    %18 = tpu.memref_squeeze %17 : memref<1x4x422xbf16, #tpu.memory_space<vmem>> -> memref<4x422xbf16, #tpu.memory_space<vmem>>
    %c0_22 = arith.constant 0 : index
    %c18 = arith.constant 18 : index
    %19 = vector.load %18[%c0_22, %c18] : memref<4x422xbf16, #tpu.memory_space<vmem>>, vector<4x384xbf16>
    %20 = arith.extf %19 : vector<4x384xbf16> to vector<4x384xf32>
    %c12 = arith.constant 12 : index
    %c0_23 = arith.constant 0 : index
    %21 = vector.load %arg5[%c12, %c0_23] : memref<36x384xf32, #tpu.memory_space<vmem>>, vector<4x384xf32>
    tpu.vector_store %arg5[%c12, %c0_23], %20 {strides = array<i32>} : memref<36x384xf32, #tpu.memory_space<vmem>>, vector<4x384xf32>,
    %c0_i32_24 = arith.constant 0 : i32
    %c0_i32_25 = arith.constant 0 : i32
    %c0_i32_26 = arith.constant 0 : i32
    %22 = tpu.memref_slice %arg1[%c0_i32_24, %c0_i32_25, %c0_i32_26] : memref<1x4x422xbf16, #tpu.memory_space<vmem>> -> memref<1x4x422xbf16, #tpu.memory_space<vmem>>
    %23 = tpu.memref_squeeze %22 : memref<1x4x422xbf16, #tpu.memory_space<vmem>> -> memref<4x422xbf16, #tpu.memory_space<vmem>>
    %c0_27 = arith.constant 0 : index
    %c19 = arith.constant 19 : index
    %24 = vector.load %23[%c0_27, %c19] : memref<4x422xbf16, #tpu.memory_space<vmem>>, vector<4x384xbf16>
    %25 = arith.extf %24 : vector<4x384xbf16> to vector<4x384xf32>
    %c16 = arith.constant 16 : index
    %c0_28 = arith.constant 0 : index
    %26 = vector.load %arg5[%c16, %c0_28] : memref<36x384xf32, #tpu.memory_space<vmem>>, vector<4x384xf32>
    tpu.vector_store %arg5[%c16, %c0_28], %25 {strides = array<i32>} : memref<36x384xf32, #tpu.memory_space<vmem>>, vector<4x384xf32>,
    %c0_i32_29 = arith.constant 0 : i32
    %c0_i32_30 = arith.constant 0 : i32
    %c0_i32_31 = arith.constant 0 : i32
    %27 = tpu.memref_slice %arg1[%c0_i32_29, %c0_i32_30, %c0_i32_31] : memref<1x4x422xbf16, #tpu.memory_space<vmem>> -> memref<1x4x422xbf16, #tpu.memory_space<vmem>>
    %28 = tpu.memref_squeeze %27 : memref<1x4x422xbf16, #tpu.memory_space<vmem>> -> memref<4x422xbf16, #tpu.memory_space<vmem>>
    %c0_32 = arith.constant 0 : index
    %c20 = arith.constant 20 : index
    %29 = vector.load %28[%c0_32, %c20] : memref<4x422xbf16, #tpu.memory_space<vmem>>, vector<4x384xbf16>
    %30 = arith.extf %29 : vector<4x384xbf16> to vector<4x384xf32>
    %c20_33 = arith.constant 20 : index
    %c0_34 = arith.constant 0 : index
    %31 = vector.load %arg5[%c20_33, %c0_34] : memref<36x384xf32, #tpu.memory_space<vmem>>, vector<4x384xf32>
    tpu.vector_store %arg5[%c20_33, %c0_34], %30 {strides = array<i32>} : memref<36x384xf32, #tpu.memory_space<vmem>>, vector<4x384xf32>,
    %c0_i32_35 = arith.constant 0 : i32
    %c0_i32_36 = arith.constant 0 : i32
    %c0_i32_37 = arith.constant 0 : i32
    %32 = tpu.memref_slice %arg1[%c0_i32_35, %c0_i32_36, %c0_i32_37] : memref<1x4x422xbf16, #tpu.memory_space<vmem>> -> memref<1x4x422xbf16, #tpu.memory_space<vmem>>
    %33 = tpu.memref_squeeze %32 : memref<1x4x422xbf16, #tpu.memory_space<vmem>> -> memref<4x422xbf16, #tpu.memory_space<vmem>>
    %c0_38 = arith.constant 0 : index
    %c36 = arith.constant 36 : index
    %34 = vector.load %33[%c0_38, %c36] : memref<4x422xbf16, #tpu.memory_space<vmem>>, vector<4x384xbf16>
    %35 = arith.extf %34 : vector<4x384xbf16> to vector<4x384xf32>
    %c24 = arith.constant 24 : index
    %c0_39 = arith.constant 0 : index
    %36 = vector.load %arg5[%c24, %c0_39] : memref<36x384xf32, #tpu.memory_space<vmem>>, vector<4x384xf32>
    tpu.vector_store %arg5[%c24, %c0_39], %35 {strides = array<i32>} : memref<36x384xf32, #tpu.memory_space<vmem>>, vector<4x384xf32>,
    %c0_i32_40 = arith.constant 0 : i32
    %c0_i32_41 = arith.constant 0 : i32
    %c0_i32_42 = arith.constant 0 : i32
    %37 = tpu.memref_slice %arg1[%c0_i32_40, %c0_i32_41, %c0_i32_42] : memref<1x4x422xbf16, #tpu.memory_space<vmem>> -> memref<1x4x422xbf16, #tpu.memory_space<vmem>>
    %38 = tpu.memref_squeeze %37 : memref<1x4x422xbf16, #tpu.memory_space<vmem>> -> memref<4x422xbf16, #tpu.memory_space<vmem>>
    %c0_43 = arith.constant 0 : index
    %c37 = arith.constant 37 : index
    %39 = vector.load %38[%c0_43, %c37] : memref<4x422xbf16, #tpu.memory_space<vmem>>, vector<4x384xbf16>
    %40 = arith.extf %39 : vector<4x384xbf16> to vector<4x384xf32>
    %c28 = arith.constant 28 : index
    %c0_44 = arith.constant 0 : index
    %41 = vector.load %arg5[%c28, %c0_44] : memref<36x384xf32, #tpu.memory_space<vmem>>, vector<4x384xf32>
    tpu.vector_store %arg5[%c28, %c0_44], %40 {strides = array<i32>} : memref<36x384xf32, #tpu.memory_space<vmem>>, vector<4x384xf32>,
    %c0_i32_45 = arith.constant 0 : i32
    %c0_i32_46 = arith.constant 0 : i32
    %c0_i32_47 = arith.constant 0 : i32
    %42 = tpu.memref_slice %arg1[%c0_i32_45, %c0_i32_46, %c0_i32_47] : memref<1x4x422xbf16, #tpu.memory_space<vmem>> -> memref<1x4x422xbf16, #tpu.memory_space<vmem>>
    %43 = tpu.memref_squeeze %42 : memref<1x4x422xbf16, #tpu.memory_space<vmem>> -> memref<4x422xbf16, #tpu.memory_space<vmem>>
    %c0_48 = arith.constant 0 : index
    %c38 = arith.constant 38 : index
    %44 = vector.load %43[%c0_48, %c38] : memref<4x422xbf16, #tpu.memory_space<vmem>>, vector<4x384xbf16>
    %45 = arith.extf %44 : vector<4x384xbf16> to vector<4x384xf32>
    %c32 = arith.constant 32 : index
    %c0_49 = arith.constant 0 : index
    %46 = vector.load %arg5[%c32, %c0_49] : memref<36x384xf32, #tpu.memory_space<vmem>>, vector<4x384xf32>
    tpu.vector_store %arg5[%c32, %c0_49], %45 {strides = array<i32>} : memref<36x384xf32, #tpu.memory_space<vmem>>, vector<4x384xf32>,
    %c0_50 = arith.constant 0 : index
    %c0_51 = arith.constant 0 : index
    %47 = vector.load %arg5[%c0_50, %c0_51] : memref<36x384xf32, #tpu.memory_space<vmem>>, vector<36x384xf32>
    %cst = arith.constant dense<0.000000e+00> : vector<32x384xf32>
    %48 = tpu.matmul %1, %47, %cst {dimension_numbers = #tpu.dot_dimension_numbers<[1], [0], [0], [1], [0, 0, 1, 1], [], []>} : vector<32x36xf32>, vector<36x384xf32>, vector<32x384xf32> -> vector<32x384xf32>
    %49 = vector.broadcast %0 : vector<1x384xf32> to vector<32x384xf32>
    %50 = arith.mulf %48, %49 : vector<32x384xf32>
    %cst_52 = arith.constant dense<0.000000e+00> : vector<32xf32>
    %51 = vector.multi_reduction <add>, %50, %cst_52 [1] : vector<32x384xf32> to vector<32xf32>
    %52 = vector.shape_cast %51 : vector<32xf32> to vector<32x1xf32>
    %53 = arith.mulf %50, %48 : vector<32x384xf32>
    %cst_53 = arith.constant dense<0.000000e+00> : vector<32xf32>
    %54 = vector.multi_reduction <add>, %53, %cst_53 [1] : vector<32x384xf32> to vector<32xf32>
    %55 = vector.shape_cast %54 : vector<32xf32> to vector<32x1xf32>
    %cst_54 = arith.constant 3.906250e-03 : f32
    %56 = vector.broadcast %cst_54 : f32 to vector<32x1xf32>
    %57 = arith.mulf %52, %56 : vector<32x1xf32>
    %cst_55 = arith.constant 3.906250e-03 : f32
    %58 = vector.broadcast %cst_55 : f32 to vector<32x1xf32>
    %59 = arith.mulf %55, %58 : vector<32x1xf32>
    %60 = arith.mulf %57, %57 : vector<32x1xf32>
    %61 = arith.subf %59, %60 : vector<32x1xf32>
    %cst_56 = arith.constant 0.000000e+00 : f32
    %62 = vector.broadcast %cst_56 : f32 to vector<32x1xf32>
    %63 = arith.maximumf %61, %62 : vector<32x1xf32>
    %64 = vector.broadcast %57 : vector<32x1xf32> to vector<32x384xf32>
    %65 = arith.subf %48, %64 : vector<32x384xf32>
    %cst_57 = arith.constant 9.99999974E-6 : f32
    %66 = vector.broadcast %cst_57 : f32 to vector<32x1xf32>
    %67 = arith.addf %63, %66 : vector<32x1xf32>
    %68 = math.rsqrt %67 : vector<32x1xf32>
    %69 = vector.broadcast %68 : vector<32x1xf32> to vector<32x384xf32>
    %70 = arith.mulf %65, %69 : vector<32x384xf32>
    %71 = vector.extract_strided_slice %70 {offsets = [0, 0], sizes = [16, 384], strides = [1, 1]} : vector<32x384xf32> to vector<16x384xf32>
    %72 = vector.extract_strided_slice %70 {offsets = [16, 0], sizes = [16, 384], strides = [1, 1]} : vector<32x384xf32> to vector<16x384xf32>
    %73 = arith.negf %72 : vector<16x384xf32>
    %74 = math.exp %73 : vector<16x384xf32>
    %cst_58 = arith.constant 1.000000e+00 : f32
    %75 = vector.broadcast %cst_58 : f32 to vector<16x384xf32>
    %76 = arith.addf %75, %74 : vector<16x384xf32>
    %77 = arith.divf %75, %76 : vector<16x384xf32>
    %78 = arith.mulf %71, %77 : vector<16x384xf32>
    %79 = arith.truncf %78 : vector<16x384xf32> to vector<16x384xbf16>
    %c0_59 = arith.constant 0 : index
    %c0_60 = arith.constant 0 : index
    %c0_61 = arith.constant 0 : index
    %80 = vector.load %arg4[%c0_59, %c0_60, %c0_61] : memref<1x16x384xbf16, #tpu.memory_space<vmem>>, vector<1x16x384xbf16>
    %81 = vector.shape_cast %80 : vector<1x16x384xbf16> to vector<16x384xbf16>
    %82 = vector.shape_cast %79 : vector<16x384xbf16> to vector<1x16x384xbf16>
    tpu.vector_store %arg4[%c0_59, %c0_60, %c0_61], %82 {strides = array<i32>} : memref<1x16x384xbf16, #tpu.memory_space<vmem>>, vector<1x16x384xbf16>,
    return
  }
  func.func @transform_0(%arg0: i32) -> (i32, i32, i32) {
    %c0_i32 = arith.constant 0 : i32
    %c0_i32_0 = arith.constant 0 : i32
    %c0_i32_1 = arith.constant 0 : i32
    return %arg0, %c0_i32, %c0_i32_0 : i32, i32, i32
  }
  func.func @transform_1(%arg0: i32) -> (i32, i32) {
    %c0_i32 = arith.constant 0 : i32
    %c0_i32_0 = arith.constant 0 : i32
    %c0_i32_1 = arith.constant 0 : i32
    return %c0_i32, %c0_i32_0 : i32, i32
  }
  func.func @transform_2(%arg0: i32) -> (i32, i32) {
    %c0_i32 = arith.constant 0 : i32
    %c0_i32_0 = arith.constant 0 : i32
    %c0_i32_1 = arith.constant 0 : i32
    return %c0_i32, %c0_i32_0 : i32, i32
  }
  func.func @transform_3(%arg0: i32) -> (i32, i32, i32) {
    %c0_i32 = arith.constant 0 : i32
    %c0_i32_0 = arith.constant 0 : i32
    %c0_i32_1 = arith.constant 0 : i32
    return %arg0, %c0_i32, %c0_i32_0 : i32, i32, i32
  }
}

</mosaic_0001>

<bundles_post_ra>
// kernel: upconv2d_forward.1
= control target key start
LH: loop header
LB: loop body
LE: loop exit
PB: predicated region body
PF: predicated region fallthrough
CT: control target
= control target key end

     0   :  { %s1030_s12 = smov 0   ;;  %s1244_s0 = inlined_call_operand.vmem [shape: bf16[2,4,422], index: 0, kind: input, shape index: {}]   ;;  %s1245_s1 = inlined_call_operand.vmem [shape: f32[32,36], index: 1, kind: input, shape index: {}]   ;;  %s1246_s2 = inlined_call_operand.vmem [shape: f32[1,384], index: 2, kind: input, shape index: {}]   ;;  %s1247_s3 = inlined_call_operand.vmem [shape: bf16[2,16,384], index: 3, kind: output, shape index: {}]  }
   0x1 LB: > { %s842_s13 = sadd.s32 4294967295, %s999_s12   ;;  %p846_p0 = scmp.ge.s32.totalorder %s999_s12, 1  ;;  %s999_s12 = sphi %s1030_s12, %s13_s12  }
   0x2   : > { %p137_p1 = scmp.lt.s32.totalorder %s999_s12, 3 }
   0x4   : > { %p138_p2 = pnand %p846_p0, %p137_p1 }
   0x5   : > { %p161_p3 = scmp.lt.s32.totalorder (!%p138_p2), %s842_s13, 1  ;;  %s1001_s18 = smov (!%p138_p2), 90  }
   0x6   : > { %141 = sbr.rel (%p138_p2) target bundleno = 603 (0x25b), region = 32  ;;  %s1002_s19 = smov (!%p138_p2), 92  }
   0x7   : > { %s1003_s20 = smov (!%p138_p2), 91   ;;  %s1004_s21 = smov (!%p138_p2), 109  }
   0x8   : > { %s1005_s22 = smov (!%p138_p2), 108   ;;  %s1006_s23 = smov (!%p138_p2), 126  }
   0x9   : > { %s1007_s24 = smov (!%p138_p2), 110   ;;  %s1008_s25 = smov (!%p138_p2), 127  }
   0xb   : > { %s1249_s13 = smov (!%p161_p3, %s842_s13), 1  ;;  %v1009_v12 = vmov 0.0   ;;  %v1057_v13 = vld [vmem:[%s1245_s1] sm:$0xff]  ;;  %vm400_vm0 = vcmask 293888   ;;  %vm325_vm1 = vcmask 752640   ;;  %vm375_vm2 = vcmask 736256  }
   0xc   : > { %s873_s14 = sshll.u32 %s1249_s13, 3  ;;  %487 = vmatprep.mubr.f32.mxu0 %v1009_v12  ;;  %897 = vmatprep.mubr.msk.f32.mxu1 %vm400_vm0, %v1057_v13  ;;  %vm350_vm3 = vcmask 744448   ;;  %vm275_vm4 = vcmask 891904   ;;  %vm300_vm5 = vcmask 883712   ;;  %vm413_vm6 = vcmask 1043456   ;;  %s903_s9 = smul.u32 24, %s1249_s13 }
   0xd   : > { %s165_s17 = scalar_lea.vmem %s1244_s0, %s873_s14  ;;  %vm225_vm7 = vcmask 1031168   ;;  %vm250_vm8 = vcmask 900096   ;;  %vm200_vm9 = vcmask 1039360  }
   0xe   : > { %v360_v0 = vld [vmem:[%s165_s17] sm:$0xff]  ;;  %s170_s13 = scalar_lea.vmem %s1247_s3, %s903_s9 }
   0xf   : > { %v361_v1 = vunpack.c.l.bf16 %v360_v0  ;;  %v362_v2 = vunpack.c.h.bf16 %v360_v0  ;;  %v176_v8 = vld [vmem:[%s165_s17] sm:$0x3f] }
  0x10   : > { %v177_v9 = vunpack.c.l.bf16 %v176_v8  ;;  %v178_v14 = vunpack.c.h.bf16 %v176_v8 }
  0x11   : > { %367 = vrot.lane.b32.xlu0 %v361_v1, %s1001_s18  ;;  %v365_v3 = vcombine.high %v361_v1, %v361_v1  ;;  %v341_v4 = vcombine.low %v362_v2, %v362_v2  ;;  %v340_v7 = vcombine.low %v361_v1, %v361_v1  ;;  %v366_v11 = vcombine.high %v362_v2, %v362_v2 }
  0x12   : > { %v180_v10 = vcombine.high %v177_v9, %v177_v9  ;;  %182 = vst [vmem:[#allocation2 + $0x30] sm:$0xf] %v177_v9  ;;  %184 = vst [vmem:[#allocation2 + $0x58] sm:$0xf] %v178_v14 }
  0x13   : > { %v926_v5 = vpack.i.bf16 %v362_v2, %v365_v3  ;;  %v931_v6 = vpack.i.bf16 %v341_v4, %v361_v1 }
  0x14   : > { %183 = vst [vmem:[#allocation2] sm:$0xf] %v180_v10 }
  0x15   : > { %317 = vrot.lane.b32.xlu0 %v361_v1, %s1002_s19  ;;  %927 = vrot.lane.b32.xlu1 %v926_v5, %s1002_s19 }
  0x19   : > { %922 = vrot.lane.b32.xlu0 %v926_v5, %s1001_s18  ;;  %932 = vrot.lane.b32.xlu1 %v931_v6, %s1003_s20 }
  0x1d   : > { %342 = vrot.lane.b32.xlu1 %v340_v7, %s1003_s20  ;;  %937 = vrot.lane.b32.xlu0 %v926_v5, %s1004_s21 }
  0x21   : > { %942 = vrot.lane.b32.xlu1 %v931_v6, %s1005_s22  ;;  %267 = vrot.lane.b32.xlu0 %v361_v1, %s1004_s21 }
  0x25   : > { %292 = vrot.lane.b32.xlu1 %v340_v7, %s1005_s22  ;;  %947 = vrot.lane.b32.xlu0 %v926_v5, %s1006_s23 }
  0x29   : > { %952 = vrot.lane.b32.xlu1 %v931_v6, %s1007_s24  ;;  %217 = vrot.lane.b32.xlu0 %v361_v1, %s1006_s23 }
  0x2d   : > { %242 = vrot.lane.b32.xlu1 %v340_v7, %s1007_s24  ;;  %957 = vrot.lane.b32.xlu0 %v931_v6, %s1008_s25 }
  0x31   : > { %373 = vrot.lane.b32.xlu0 %v366_v11, %s1001_s18  ;;  %192 = vrot.lane.b32.xlu1 %v340_v7, %s1008_s25 }
  0x35   : > { %348 = vrot.lane.b32.xlu0 %v362_v2, %s1003_s20  ;;  %323 = vrot.lane.b32.xlu1 %v366_v11, %s1002_s19 }
  0x39   : > { %298 = vrot.lane.b32.xlu0 %v362_v2, %s1005_s22  ;;  %273 = vrot.lane.b32.xlu1 %v366_v11, %s1004_s21 }
  0x3d   : > { %248 = vrot.lane.b32.xlu0 %v362_v2, %s1007_s24  ;;  %223 = vrot.lane.b32.xlu1 %v366_v11, %s1006_s23 }
  0x41   : > { %198 = vrot.lane.b32.xlu1 %v362_v2, %s1008_s25 }
  0x83   : > { %v368_v15 = vpop.permute.xlu0 %367 }
  0x87   : > { %v318_v16 = vpop.permute.xlu0 %317  ;;  %v1064_v17 = vpop.permute.xlu1 %927 }
  0x88   : > { %v930_v18 = vunpack.i.h.bf16 %v1064_v17  ;;  %v929_v19 = vunpack.i.l.bf16 %v1064_v17 }
  0x8a   : > { %v326_v20 = vsel %vm325_vm1, %v318_v16, %v929_v19  ;;  %v327_v21 = vsel %vm325_vm1, %v929_v19, %v930_v18 }
  0x8b   : > { %332 = vst [vmem:[#allocation2 + $0x20] sm:$0xf] %v326_v20  ;;  %333 = vst [vmem:[#allocation2 + $0x10] sm:$0xf] %v327_v21  ;;  %v1072_v22 = vpop.permute.xlu0 %922  ;;  %v1074_v23 = vpop.permute.xlu1 %932 }
  0x8c   : > { %v925_v24 = vunpack.i.h.bf16 %v1072_v22  ;;  %v924_v25 = vunpack.i.l.bf16 %v1072_v22  ;;  %v935_v26 = vunpack.i.h.bf16 %v1074_v23  ;;  %v934_v27 = vunpack.i.l.bf16 %v1074_v23 }
  0x8e   : > { %v376_v28 = vsel %vm375_vm2, %v368_v15, %v924_v25  ;;  %v377_v29 = vsel %vm375_vm2, %v924_v25, %v925_v24  ;;  %v352_v30 = vsel %vm350_vm3, %v934_v27, %v935_v26 }
  0x8f   : > { %382 = vst [vmem:[#allocation2 + $0x60] sm:$0xf] %v376_v28  ;;  %383 = vst [vmem:[#allocation2 + $0x70] sm:$0xf] %v377_v29  ;;  %v343_v31 = vpop.permute.xlu1 %342  ;;  %v1087_v32 = vpop.permute.xlu0 %937  ;;  %v174_v28 = vld [vmem:[%s1245_s1 + $0x10] sm:$0xff] }
  0x90   : > { %358 = vst [vmem:[#allocation2 + $0x10] sm:$0xf0] %v352_v30  ;;  %v351_v33 = vsel %vm350_vm3, %v343_v31, %v934_v27  ;;  %v940_v34 = vunpack.i.h.bf16 %v1087_v32  ;;  %v939_v35 = vunpack.i.l.bf16 %v1087_v32  ;;  %v175_v31 = vld [vmem:[%s1245_s1 + $0x18] sm:$0xff] }
  0x91   : > { %357 = vst [vmem:[#allocation2 + $0x20] sm:$0xf0] %v351_v33 }
  0x92   : > { %v277_v36 = vsel %vm275_vm4, %v939_v35, %v940_v34 }
  0x93   : > { %v1095_v37 = vpop.permute.xlu1 %942  ;;  %v268_v38 = vpop.permute.xlu0 %267  ;;  %283 = vst [vmem:[#allocation2 + $0x48] sm:$0xf] %v277_v36 }
  0x94   : > { %v945_v39 = vunpack.i.h.bf16 %v1095_v37  ;;  %v944_v40 = vunpack.i.l.bf16 %v1095_v37  ;;  %v276_v41 = vsel %vm275_vm4, %v268_v38, %v939_v35 }
  0x95   : > { %282 = vst [vmem:[#allocation2 + $0x8] sm:$0xf] %v276_v41 }
  0x96   : > { %v398_v42 = vld [vmem:[#allocation2 + $0x70] sm:$0xf]  ;;  %v302_v43 = vsel %vm300_vm5, %v944_v40, %v945_v39  ;;  %v397_v44 = vld [vmem:[#allocation2 + $0x60] sm:$0xf] }
  0x97   : > { %850 = vmatprep.subr.msk.mxu0 %vm413_vm6, %v398_v42  ;;  %308 = vst [vmem:[#allocation2 + $0x48] sm:$0xf0] %v302_v43  ;;  %v293_v45 = vpop.permute.xlu1 %292  ;;  %v1104_v46 = vpop.permute.xlu0 %947  ;;  %v395_v50 = vld [vmem:[#allocation2 + $0x10] sm:$0xff]  ;;  %v171_v43 = vld [vmem:[%s1246_s2] sm:$0x7] }
  0x98   : > { %v301_v47 = vsel %vm300_vm5, %v293_v45, %v944_v40  ;;  %v950_v48 = vunpack.i.h.bf16 %v1104_v46  ;;  %v949_v49 = vunpack.i.l.bf16 %v1104_v46  ;;  %851 = vmatpush1.msk.msra.mxu0 %vm413_vm6, %v397_v44  ;;  %v394_v51 = vld [vmem:[#allocation2 + $0x20] sm:$0xff] }
  0x99   : > { %307 = vst [vmem:[#allocation2 + $0x8] sm:$0xf0] %v301_v47  ;;  %447 = vmatprep.subr.mxu0 %v395_v50 }
  0x9a   : > { %448 = vmatpush1.msra.mxu0 %v394_v51  ;;  %v227_v52 = vsel %vm225_vm7, %v949_v49, %v950_v48 }
  0x9b   : > { %v953_v53 = vpop.permute.xlu1 %952  ;;  %v218_v54 = vpop.permute.xlu0 %217  ;;  %233 = vst [vmem:[#allocation2 + $0x50] sm:$0xf] %v227_v52 }
  0x9c   : > { %v955_v55 = vunpack.i.h.bf16 %v953_v53  ;;  %v954_v56 = vunpack.i.l.bf16 %v953_v53  ;;  %v226_v57 = vsel %vm225_vm7, %v218_v54, %v949_v49 }
  0x9d   : > { %232 = vst [vmem:[#allocation2 + $0x18] sm:$0xf] %v226_v57 }
  0x9e   : > { %v392_v58 = vld [vmem:[#allocation2 + $0x48] sm:$0xff]  ;;  %v252_v59 = vsel %vm250_vm8, %v954_v56, %v955_v55 }
  0x9f   : > { %449 = vmatprep.subr.mxu0 %v392_v58  ;;  %258 = vst [vmem:[#allocation2 + $0x50] sm:$0xf0] %v252_v59  ;;  %v243_v60 = vpop.permute.xlu1 %242  ;;  %v958_v61 = vpop.permute.xlu0 %957 }
  0xa0   : > { %v251_v62 = vsel %vm250_vm8, %v243_v60, %v954_v56  ;;  %v960_v63 = vunpack.i.h.bf16 %v958_v61  ;;  %v959_v0 = vunpack.i.l.bf16 %v958_v61  ;;  %v391_v1 = vld [vmem:[#allocation2 + $0x8] sm:$0xff] }
  0xa1   : > { %257 = vst [vmem:[#allocation2 + $0x18] sm:$0xf0] %v251_v62  ;;  %450 = vmatpush1.msra.mxu0 %v391_v1 }
  0xa2   : > { %v202_v2 = vsel %vm200_vm9, %v959_v0, %v960_v63 }
  0xa3   : > { %v374_v3 = vpop.permute.xlu0 %373  ;;  %208 = vst [vmem:[#allocation2] sm:$0xf0] %v202_v2  ;;  %v193_v4 = vpop.permute.xlu1 %192 }
  0xa4   : > { %v378_v5 = vsel %vm375_vm2, %v925_v24, %v374_v3  ;;  %v201_v6 = vsel %vm200_vm9, %v193_v4, %v959_v0  ;;  %v173_v24 = vld [vmem:[%s1245_s1 + $0x8] sm:$0xff] }
  0xa5   : > { %384 = vst [vmem:[#allocation2 + $0x28] sm:$0xf] %v378_v5  ;;  %207 = vst [vmem:[#allocation2 + $0x30] sm:$0xf0] %v201_v6 }
  0xa6   : > { %v389_v7 = vld [vmem:[#allocation2 + $0x50] sm:$0xff] }
  0xa7   : > { %451 = vmatprep.subr.mxu0 %v389_v7  ;;  %v349_v8 = vpop.permute.xlu0 %348  ;;  %v324_v9 = vpop.permute.xlu1 %323 }
  0xa8   : > { %v353_v10 = vsel %vm350_vm3, %v935_v26, %v349_v8  ;;  %v328_v11 = vsel %vm325_vm1, %v930_v18, %v324_v9  ;;  %v388_v14 = vld [vmem:[#allocation2 + $0x18] sm:$0xff] }
  0xa9   : > { %359 = vst [vmem:[#allocation2 + $0x38] sm:$0xf0] %v353_v10  ;;  %334 = vst [vmem:[#allocation2 + $0x38] sm:$0xf] %v328_v11  ;;  %452 = vmatpush1.msra.mxu0 %v388_v14 }
  0xaa   : > { %v386_v15 = vld [vmem:[#allocation2] sm:$0xff] }
  0xab   : > { %v299_v16 = vpop.permute.xlu0 %298  ;;  %v274_v19 = vpop.permute.xlu1 %273  ;;  %453 = vmatprep.subr.mxu0 %v386_v15 }
  0xac   : > { %v303_v20 = vsel %vm300_vm5, %v945_v39, %v299_v16  ;;  %v278_v21 = vsel %vm275_vm4, %v940_v34, %v274_v19  ;;  %v385_v22 = vld [vmem:[#allocation2 + $0x30] sm:$0xff]  ;;  %v399_v17 = vld [vmem:[#allocation2 + $0x28] sm:$0xf] }
  0xad   : > { %309 = vst [vmem:[#allocation2 + $0x40] sm:$0xf0] %v303_v20  ;;  %284 = vst [vmem:[#allocation2 + $0x40] sm:$0xf] %v278_v21  ;;  %454 = vmatpush1.msra.mxu0 %v385_v22  ;;  %887 = vmatprep.subr.msk.mxu1 %vm413_vm6, %v399_v17 }
  0xae   : > { %888 = vmatpush3.msk.msra.mxu1 %vm413_vm6, %v399_v17  ;;  %852 = vmatmul.mubr.msk.f32.vlgmr.msra.gmra.mxu0 %vm400_vm0, %v1057_v13 }
  0xaf   : > { %v249_v18 = vpop.permute.xlu0 %248  ;;  %v224_v23 = vpop.permute.xlu1 %223  ;;  %493 = vmatprep.mubr.f32.mxu0 %v1009_v12 }
  0xb0   : > { %v253_v25 = vsel %vm250_vm8, %v955_v55, %v249_v18  ;;  %v228_v26 = vsel %vm225_vm7, %v950_v48, %v224_v23  ;;  %v396_v27 = vld [vmem:[#allocation2 + $0x38] sm:$0xff] }
  0xb1   : > { %259 = vst [vmem:[#allocation2 + $0x68] sm:$0xf0] %v253_v25  ;;  %234 = vst [vmem:[#allocation2 + $0x68] sm:$0xf] %v228_v26  ;;  %889 = vmatprep.subr.mxu1 %v396_v27 }
  0xb2   : > { %890 = vmatpush3.msra.mxu1 %v396_v27  ;;  %853 = vmatmul.mubr.msk.f32.gmra.mxu0 %vm400_vm0, %v173_v24 }
  0xb3   : > { %v199_v13 = vpop.permute.xlu1 %198  ;;  %499 = vmatprep.mubr.f32.mxu0 %v1009_v12 }
  0xb4   : > { %v203_v29 = vsel %vm200_vm9, %v960_v63, %v199_v13  ;;  %v393_v30 = vld [vmem:[#allocation2 + $0x40] sm:$0xff] }
  0xb5   : > { %209 = vst [vmem:[#allocation2 + $0x58] sm:$0xf0] %v203_v29  ;;  %891 = vmatprep.subr.mxu1 %v393_v30 }
  0xb6   : > { %892 = vmatpush3.msra.mxu1 %v393_v30  ;;  %854 = vmatmul.mubr.msk.f32.gmra.mxu0 %vm400_vm0, %v174_v28 }
  0xb7   : > { %505 = vmatprep.mubr.f32.mxu0 %v1009_v12  ;;  %v598_v12 = vlaneseq }
  0xb8   : > { %v390_v32 = vld [vmem:[#allocation2 + $0x68] sm:$0xff] }
  0xb9   : > { %893 = vmatprep.subr.mxu1 %v390_v32  ;;  %v599_v37 = vshrl.u32 %v598_v12, 7 }
  0xba   : > { %894 = vmatpush3.msra.mxu1 %v390_v32  ;;  %855 = vmatmul.mubr.msk.f32.gmra.mxu0 %vm400_vm0, %v175_v31 }
  0xbb   : > { %v600_v40 = vsub.s32 0, %v599_v37  ;;  %v604_v41 = vsub.s32 1, %v599_v37  ;;  %v608_v50 = vsub.s32 2, %v599_v37 }
  0xbc   : > { %v387_v33 = vld [vmem:[#allocation2 + $0x58] sm:$0xff] }
  0xbd   : > { %895 = vmatprep.subr.mxu1 %v387_v33  ;;  %v601_v45 = vrot.slane %v171_v43, %v600_v40  ;;  %v605_v46 = vrot.slane %v171_v43, %v604_v41  ;;  %v609_v55 = vrot.slane %v171_v43, %v608_v50 }
  0xbe   : > { %896 = vmatpush3.msra.mxu1 %v387_v33 }
  0xbf   : > { %898 = vmatmul.mubr.msk.f32.vlgmr.msra.gmra.mxu1 %vm400_vm0, %v173_v24 }
  0xc0   : > { %900 = vmatprep.mubr.msk.f32.mxu1 %vm400_vm0, %v174_v28 }
  0xc3   : > { %901 = vmatmul.mubr.msk.f32.gmra.mxu1 %vm400_vm0, %v175_v31 }
 0x16e   : > { %v1160_v34 = vpop.f32.mrf.mxu0 }
 0x16f   : > { %v613_v57 = vmul.f32 %v601_v45, %v1160_v34 }
 0x170   : > { %v1162_v35 = vpop.f32.mrf.mxu0 }
 0x171   : > { %v614_v58 = vmul.f32 %v605_v46, %v1162_v35  ;;  %v641_v4 = vmul.f32 %v613_v57, %v1160_v34 }
 0x172   : > { %v1164_v36 = vpop.f32.mrf.mxu0 }
 0x173   : > { %v642_v5 = vmul.f32 %v614_v58, %v1162_v35  ;;  %v625_v6 = vadd.f32 %v614_v58, %v613_v57  ;;  %v616_v22 = vmul.f32 %v601_v45, %v1164_v36 }
 0x174   : > { %v1166_v38 = vpop.f32.mrf.mxu0 }
 0x175   : > { %v653_v19 = vadd.f32 %v642_v5, %v641_v4  ;;  %v617_v17 = vmul.f32 %v605_v46, %v1166_v38  ;;  %v644_v26 = vmul.f32 %v616_v22, %v1164_v36 }
 0x176   : > { %v1168_v39 = vpop.f32.mrf.mxu0 }
 0x177   : > { %v619_v52 = vmul.f32 %v601_v45, %v1168_v39  ;;  %v629_v25 = vadd.f32 %v617_v17, %v616_v22  ;;  %v645_v27 = vmul.f32 %v617_v17, %v1166_v38 }
 0x178   : > { %v1170_v42 = vpop.f32.mrf.mxu0 }
 0x179   : > { %v620_v53 = vmul.f32 %v605_v46, %v1170_v42  ;;  %v647_v61 = vmul.f32 %v619_v52, %v1168_v39  ;;  %v657_v29 = vadd.f32 %v645_v27, %v644_v26 }
 0x17a   : > { %v1175_v44 = vpop.f32.mrf.mxu0 }
 0x17b   : > { %v622_v48 = vmul.f32 %v601_v45, %v1175_v44  ;;  %v648_v62 = vmul.f32 %v620_v53, %v1170_v42  ;;  %v633_v2 = vadd.f32 %v620_v53, %v619_v52 }
 0x17c   : > { %v1177_v47 = vpop.f32.mrf.mxu0 }
 0x17d   : > { %v623_v49 = vmul.f32 %v605_v46, %v1177_v47  ;;  %v650_v7 = vmul.f32 %v622_v48, %v1175_v44  ;;  %v661_v14 = vadd.f32 %v648_v62, %v647_v61 }
 0x17f   : > { %v1181_v51 = vpop.f32.mrf.mxu1  ;;  %v637_v56 = vadd.f32 %v623_v49, %v622_v48  ;;  %v651_v8 = vmul.f32 %v623_v49, %v1177_v47 }
 0x180   : > { %v618_v24 = vmul.f32 %v1181_v51, %v609_v55 }
 0x181   : > { %v1185_v54 = vpop.f32.mrf.mxu1  ;;  %v665_v21 = vadd.f32 %v651_v8, %v650_v7 }
 0x182   : > { %v615_v3 = vmul.f32 %v609_v55, %v1185_v54  ;;  %v630_v13 = vadd.f32 %v629_v25, %v618_v24  ;;  %v646_v28 = vmul.f32 %v1181_v51, %v618_v24 }
 0x183   : > { %v1189_v59 = vpop.f32.mrf.mxu1 }
 0x184   : > { %v624_v60 = vmul.f32 %v1189_v59, %v609_v55  ;;  %v626_v11 = vadd.f32 %v625_v6, %v615_v3  ;;  %v643_v15 = vmul.f32 %v615_v3, %v1185_v54  ;;  %v658_v30 = vadd.f32 %v657_v29, %v646_v28 }
 0x185   : > { %v1194_v63 = vpop.f32.mrf.mxu1 }
 0x186   : > { %v621_v0 = vmul.f32 %v609_v55, %v1194_v63  ;;  %v638_v1 = vadd.f32 %v637_v56, %v624_v60  ;;  %v652_v20 = vmul.f32 %v1189_v59, %v624_v60  ;;  %v654_v18 = vadd.f32 %v653_v19, %v643_v15 }
 0x188   : > { %v649_v9 = vmul.f32 %v621_v0, %v1194_v63  ;;  %639 = vadd.xlane.f32.xlu1 %v638_v1  ;;  %v634_v10 = vadd.f32 %v633_v2, %v621_v0  ;;  %v666_v23 = vadd.f32 %v665_v21, %v652_v20 }
 0x18a   : > { %635 = vadd.xlane.f32.xlu0 %v634_v10  ;;  %v662_v16 = vadd.f32 %v661_v14, %v649_v9 }
 0x18c   : > { %627 = vadd.xlane.f32.xlu1 %v626_v11 }
 0x18e   : > { %663 = vadd.xlane.f32.xlu0 %v662_v16 }
 0x190   : > { %655 = vadd.xlane.f32.xlu1 %v654_v18 }
 0x192   : > { %667 = vadd.xlane.f32.xlu0 %v666_v23 }
 0x196   : > { %631 = vadd.xlane.f32.xlu0 %v630_v13 }
 0x19a   : > { %659 = vadd.xlane.f32.xlu0 %v658_v30 }
 0x211   : > { %v640_v33 = vpop.xlane.xlu1 %639 }
 0x212   : > { %v672_v37 = vmul.f32 0.00390625, %v640_v33 }
 0x213   : > { %v636_v31 = vpop.xlane.xlu0 %635 }
 0x214   : > { %v671_v32 = vmul.f32 0.00390625, %v636_v31  ;;  %v680_v49 = vmul.f32 %v672_v37, %v672_v37  ;;  %v698_v7 = vsub.f32 %v1175_v44, %v672_v37  ;;  %v699_v8 = vsub.f32 %v1177_v47, %v672_v37 }
 0x215   : > { %v628_v56 = vpop.xlane.xlu1 %627 }
 0x216   : > { %v679_v40 = vmul.f32 %v671_v32, %v671_v32  ;;  %v1211_v60 = vmul.f32 0.00390625, %v628_v56  ;;  %v695_v61 = vsub.f32 %v1168_v39, %v671_v32  ;;  %v696_v62 = vsub.f32 %v1170_v42, %v671_v32 }
 0x217   : > { %v664_v12 = vpop.xlane.xlu0 %663  ;;  %v697_v0 = vsub.f32 %v1194_v63, %v671_v32  ;;  %v700_v39 = vsub.f32 %v1189_v59, %v672_v37 }
 0x218   : > { %v675_v41 = vmul.f32 0.00390625, %v664_v12  ;;  %v677_v9 = vmul.f32 %v1211_v60, %v1211_v60 }
 0x219   : > { %v656_v58 = vpop.xlane.xlu1 %655 }
 0x21a   : > { %v683_v43 = vsub.f32 %v675_v41, %v679_v40  ;;  %v673_v2 = vmul.f32 0.00390625, %v656_v58 }
 0x21b   : > { %v668_v45 = vpop.xlane.xlu0 %667 }
 0x21c   : > { %v687_v46 = vmax.f32 %v683_v43, 0.0  ;;  %v676_v48 = vmul.f32 0.00390625, %v668_v45  ;;  %v681_v15 = vsub.f32 %v673_v2, %v677_v9  ;;  %v689_v43 = vsub.f32 %v1160_v34, %v1211_v60 }
 0x21d   : > { %v690_v45 = vsub.f32 %v1162_v35, %v1211_v60 }
 0x21e   : > { %v703_v50 = vadd.f32 1e-05, %v687_v46  ;;  %v684_v52 = vsub.f32 %v676_v48, %v680_v49  ;;  %v685_v59 = vmax.f32 %v681_v15, 0.0  ;;  %v691_v48 = vsub.f32 %v1185_v54, %v1211_v60 }
 0x21f   : > { %v632_v57 = vpop.xlane.xlu0 %631 }
 0x220   : > { %961 = vrsqrt.f32 %v703_v50  ;;  %v688_v53 = vmax.f32 %v684_v52, 0.0  ;;  %v1220_v10 = vmul.f32 0.00390625, %v632_v57  ;;  %v701_v24 = vadd.f32 1e-05, %v685_v59 }
 0x222   : > { %v704_v55 = vadd.f32 1e-05, %v688_v53  ;;  %v678_v44 = vmul.f32 %v1220_v10, %v1220_v10  ;;  %v692_v57 = vsub.f32 %v1164_v36, %v1220_v10  ;;  %v693_v34 = vsub.f32 %v1166_v38, %v1220_v10 }
 0x223   : > { %v660_v6 = vpop.xlane.xlu0 %659  ;;  %v694_v54 = vsub.f32 %v1181_v51, %v1220_v10 }
 0x224   : > { %963 = vrsqrt.f32 %v704_v55  ;;  %v674_v16 = vmul.f32 0.00390625, %v660_v6 }
 0x226   : > { %v682_v18 = vsub.f32 %v674_v16, %v678_v44 }
 0x228   : > { %v686_v23 = vmax.f32 %v682_v18, 0.0 }
 0x22a   : > { %v702_v25 = vadd.f32 1e-05, %v686_v23 }
 0x22d   : > { %v962_v1 = vpop.eup %961 }
 0x22e   : > { %v715_v3 = vmul.f32 %v962_v1, %v695_v61  ;;  %v716_v4 = vmul.f32 %v962_v1, %v696_v62  ;;  %v717_v5 = vmul.f32 %v962_v1, %v697_v0 }
 0x230   : > { %v861_v42 = vmul.f32 -1.442695, %v715_v3  ;;  %v862_v11 = vmul.f32 -1.442695, %v716_v4  ;;  %v863_v63 = vmul.f32 -1.442695, %v717_v5 }
 0x231   : > { %v964_v14 = vpop.eup %963 }
 0x232   : > { %965 = vpow2.f32 %v861_v42  ;;  %v718_v19 = vmul.f32 %v964_v14, %v698_v7  ;;  %v719_v20 = vmul.f32 %v964_v14, %v699_v8  ;;  %v720_v21 = vmul.f32 %v964_v14, %v700_v39 }
 0x233   : > { %967 = vpow2.f32 %v862_v11 }
 0x234   : > { %969 = vpow2.f32 %v863_v63  ;;  %v864_v47 = vmul.f32 -1.442695, %v718_v19  ;;  %v865_v22 = vmul.f32 -1.442695, %v719_v20  ;;  %v866_v17 = vmul.f32 -1.442695, %v720_v21 }
 0x236   : > { %971 = vpow2.f32 %v864_v47 }
 0x237   : > { %973 = vpow2.f32 %v865_v22 }
 0x238   : > { %975 = vpow2.f32 %v866_v17 }
 0x239   : > { %977 = vrsqrt.f32 %v701_v24 }
 0x23a   : > { %979 = vrsqrt.f32 %v702_v25 }
 0x23f   : > { %v966_v26 = vpop.eup %965 }
 0x240   : > { %v968_v27 = vpop.eup %967  ;;  %v739_v13 = vadd.f32 1.0, %v966_v26 }
 0x241   : > { %v970_v28 = vpop.eup %969  ;;  %v740_v29 = vadd.f32 1.0, %v968_v27 }
 0x242   : > { %v741_v30 = vadd.f32 1.0, %v970_v28  ;;  %981 = vrcp.f32 %v739_v13 }
 0x243   : > { %v972_v31 = vpop.eup %971  ;;  %983 = vrcp.f32 %v740_v29 }
 0x244   : > { %v974_v32 = vpop.eup %973  ;;  %985 = vrcp.f32 %v741_v30  ;;  %v742_v33 = vadd.f32 1.0, %v972_v31 }
 0x245   : > { %v976_v12 = vpop.eup %975  ;;  %v743_v37 = vadd.f32 1.0, %v974_v32 }
 0x246   : > { %v744_v40 = vadd.f32 1.0, %v976_v12  ;;  %987 = vrcp.f32 %v742_v33  ;;  %v978_v41 = vpop.eup %977 }
 0x247   : > { %989 = vrcp.f32 %v743_v37  ;;  %v980_v46 = vpop.eup %979  ;;  %v709_v49 = vmul.f32 %v978_v41, %v689_v43  ;;  %v710_v52 = vmul.f32 %v978_v41, %v690_v45  ;;  %v711_v55 = vmul.f32 %v978_v41, %v691_v48 }
 0x248   : > { %991 = vrcp.f32 %v744_v40  ;;  %v712_v60 = vmul.f32 %v980_v46, %v692_v57  ;;  %v713_v1 = vmul.f32 %v980_v46, %v693_v34  ;;  %v714_v36 = vmul.f32 %v980_v46, %v694_v54 }
 0x24f   : > { %v982_v50 = vpop.eup %981 }
 0x250   : > { %v984_v53 = vpop.eup %983  ;;  %v757_v56 = vmul.f32 %v982_v50, %v709_v49 }
 0x251   : > { %v986_v58 = vpop.eup %985  ;;  %v758_v61 = vmul.f32 %v984_v53, %v710_v52 }
 0x252   : > { %v759_v35 = vmul.f32 %v986_v58, %v711_v55 }
 0x253   : > { %v988_v62 = vpop.eup %987  ;;  %v874_v0 = vpack.c.bf16 %v758_v61, %v757_v56 }
 0x254   : > { %v990_v2 = vpop.eup %989  ;;  %v875_v3 = vpack.c.bf16 %v759_v35, %v759_v35  ;;  %v760_v4 = vmul.f32 %v988_v62, %v712_v60 }
 0x255   : > { %v992_v5 = vpop.eup %991  ;;  %783 = vst [vmem:[%s170_s13] sm:$0xff] %v874_v0  ;;  %v761_v6 = vmul.f32 %v990_v2, %v713_v1 }
 0x256   : > { %784 = vst [vmem:[%s170_s13 + $0x8] sm:$0xf] %v875_v3  ;;  %v762_v38 = vmul.f32 %v992_v5, %v714_v36 }
 0x257   : > { %v876_v7 = vpack.c.bf16 %v761_v6, %v760_v4 }
 0x258   : > { %v877_v8 = vpack.c.bf16 %v762_v38, %v762_v38 }
 0x259   : > { %785 = vst [vmem:[%s170_s13 + $0xc] sm:$0xff] %v876_v7 }
 0x25a   : > { %786 = vst [vmem:[%s170_s13 + $0x14] sm:$0xf] %v877_v8 }
 0x25b PF: > { %s13_s12 = sadd.s32 1, %s999_s12  }
 0x25c   : > { %p10_p4 = scmp.ge.s32.totalorder %s13_s12, 4  }
 0x25e   :  { %12 = sbr.rel (!%p10_p4) target bundleno = 1 (0x1), region = 62 }

</bundles_post_ra>
